<compile_context>
chip_gen: v6e
topology: v6e:2x2x1
jax: 0.10.0
libtpu: 0.0.40
codegen_flags: <defaults>
</compile_context>

<pallas_src>
import functools

import jax
import jax.numpy as jnp
from jax.experimental import pallas as pl
from jax.experimental.pallas import tpu as pltpu


def _nlm_affinity_kernel(in1_ref, in2_ref, out_ref):
    # in1_ref : (1, cp, TQ)   in2_ref : (1, cp, TK)   out_ref : (1, TQ, TK)
    a = in1_ref[0]  # (cp, TQ)
    b = in2_ref[0]  # (cp, TK)
    # affinity_tile[p, q] = sum_c a[c, p] * b[c, q]
    # (transposed-LHS matmul; contraction over channels -> no explicit transpose)
    aff = jax.lax.dot_general(
        a,
        b,
        dimension_numbers=(((0,), (0,)), ((), ())),
        preferred_element_type=jnp.float32,
    )
    out_ref[0] = aff.astype(out_ref.dtype)


def _round_up(x: int, m: int) -> int:
    return ((x + m - 1) // m) * m


@functools.partial(jax.jit, static_argnames=("tq", "tk", "out_dtype"))
def nlm_wo_soft(in1: jax.Array, in2: jax.Array, *, tq: int = 512, tk: int = 4096,
                out_dtype=None) -> jax.Array:
    """in1, in2: (n, c, h, w) -> affinity (n, h*w, h*w)."""
    n, c, h, w = in1.shape
    hw = h * w
    if out_dtype is None:
        out_dtype = in1.dtype  # matches torch.bmm; bf16 opt-in halves writeback
    in_itemsize = jnp.dtype(in1.dtype).itemsize
    out_itemsize = jnp.dtype(out_dtype).itemsize

    in1_f = in1.reshape(n, c, hw)
    in2_f = in2.reshape(n, c, hw)

    # Dtype-aware channel padding: 8 rows for 4-byte, 16 for 2-byte, 32 for
    # 1-byte dtypes, so the (cp, T*) operand vregs stay densely packed.
    c_align = 8 * max(1, 4 // in_itemsize)
    c_pad = -c % c_align
    if c_pad:
        in1_f = jnp.pad(in1_f, ((0, 0), (0, c_pad), (0, 0)))
        in2_f = jnp.pad(in2_f, ((0, 0), (0, c_pad), (0, 0)))
    cp = c + c_pad

    # Tile sizes: round user-supplied tiles to multiples of 128 (lane-dense,
    # unmasked vst) and clamp to the 128-rounded spatial extent.
    hw128 = _round_up(hw, 128)
    tq_eff = min(max(128, _round_up(tq, 128)), hw128)
    tk_eff = min(max(128, _round_up(tk, 128)), hw128)

    # v7x megacore: if the grid would collapse to a single program for n == 1,
    # split the q axis so both TensorCores get work.
    if (n == 1 and pl.cdiv(hw, tq_eff) == 1 and pl.cdiv(hw, tk_eff) == 1
            and hw128 >= 256):
        tq_eff = _round_up(pl.cdiv(hw128, 2), 128)

    n_q = pl.cdiv(hw, tq_eff)
    n_k = pl.cdiv(hw, tk_eff)

    # Innermost grid axis varies q (the small in1 tile); the larger in2 tile
    # is held resident across the inner loop.
    grid = (n, n_k, n_q)

    grid_spec = pltpu.PrefetchScalarGridSpec(
        num_scalar_prefetch=0,
        grid=grid,
        in_specs=[
            pl.BlockSpec((1, cp, tq_eff), lambda b, j, i: (b, 0, i)),
            pl.BlockSpec((1, cp, tk_eff), lambda b, j, i: (b, 0, j)),
        ],
        out_specs=pl.BlockSpec((1, tq_eff, tk_eff), lambda b, j, i: (b, i, j)),
    )

    cost = pl.CostEstimate(
        flops=2 * n * cp * hw * hw,
        transcendentals=0,
        bytes_accessed=n * (2 * cp * hw * in_itemsize + hw * hw * out_itemsize),
    )

    return pl.pallas_call(
        _nlm_affinity_kernel,
        out_shape=jax.ShapeDtypeStruct((n, hw, hw), out_dtype),
        grid_spec=grid_spec,
        compiler_params=pltpu.CompilerParams(
            dimension_semantics=("parallel", "parallel", "parallel"),
            vmem_limit_bytes=32 * 1024 * 1024,
        ),
        cost_estimate=cost,
    )(in1_f, in2_f)


if __name__ == "__main__":
    key = jax.random.PRNGKey(0)
    k1, k2 = jax.random.split(key)

    n, c, h, w = 2, 4, 16, 16
    in1 = jax.random.normal(k1, (n, c, h, w), dtype=jnp.float32)
    in2 = jax.random.normal(k2, (n, c, h, w), dtype=jnp.float32)

    affinity = nlm_wo_soft(in1, in2)
    jax.block_until_ready(affinity)

    # Reference check against plain JAX (mirrors torch.bmm semantics).
    ref = jnp.einsum(
        "ncp,ncq->npq", in1.reshape(n, c, h * w), in2.reshape(n, c, h * w)
    )
    assert affinity.shape == (n, h * w, h * w)
    assert affinity.dtype == in1.dtype
    assert jnp.allclose(affinity, ref, atol=1e-4, rtol=1e-4)

    print("KERNEL_OK")
</pallas_src>

<mosaic_0001>
module attributes {stable_mosaic.version = 11 : i64} {
  func.func @_nlm_affinity_kernel(%arg0: i32, %arg1: i32, %arg2: i32, %arg3: memref<1x8x256xf32, #tpu.memory_space<vmem>>, %arg4: memref<1x8x256xf32, #tpu.memory_space<vmem>>, %arg5: memref<1x256x256xf32, #tpu.memory_space<vmem>>) attributes {dimension_semantics = [#tpu.dimension_semantics<parallel>, #tpu.dimension_semantics<parallel>, #tpu.dimension_semantics<parallel>], iteration_bounds = array<i64: 2, 1, 1>, scalar_prefetch = 0 : i64, scratch_operands = 0 : i64, tpu.core_type = #tpu.core_type<tc>, window_params = [{transform_indices = @transform_0, window_bounds = array<i64: 1, 8, 256>}, {transform_indices = @transform_1, window_bounds = array<i64: 1, 8, 256>}, {transform_indices = @transform_2, window_bounds = array<i64: 1, 256, 256>}]} {
    %c0 = arith.constant 0 : index
    %c0_0 = arith.constant 0 : index
    %c0_1 = arith.constant 0 : index
    %0 = vector.load %arg3[%c0, %c0_0, %c0_1] : memref<1x8x256xf32, #tpu.memory_space<vmem>>, vector<1x8x256xf32>
    %1 = vector.shape_cast %0 : vector<1x8x256xf32> to vector<8x256xf32>
    %c0_2 = arith.constant 0 : index
    %c0_3 = arith.constant 0 : index
    %c0_4 = arith.constant 0 : index
    %2 = vector.load %arg4[%c0_2, %c0_3, %c0_4] : memref<1x8x256xf32, #tpu.memory_space<vmem>>, vector<1x8x256xf32>
    %3 = vector.shape_cast %2 : vector<1x8x256xf32> to vector<8x256xf32>
    %cst = arith.constant dense<0.000000e+00> : vector<256x256xf32>
    %4 = tpu.matmul %1, %3, %cst {dimension_numbers = #tpu.dot_dimension_numbers<[0], [0], [1], [1], [0, 1, 1, 1], [], []>} : vector<8x256xf32>, vector<8x256xf32>, vector<256x256xf32> -> vector<256x256xf32>
    %c0_5 = arith.constant 0 : index
    %c0_6 = arith.constant 0 : index
    %c0_7 = arith.constant 0 : index
    %5 = vector.load %arg5[%c0_5, %c0_6, %c0_7] : memref<1x256x256xf32, #tpu.memory_space<vmem>>, vector<1x256x256xf32>
    %6 = vector.shape_cast %5 : vector<1x256x256xf32> to vector<256x256xf32>
    %7 = vector.shape_cast %4 : vector<256x256xf32> to vector<1x256x256xf32>
    tpu.vector_store %arg5[%c0_5, %c0_6, %c0_7], %7 {strides = array<i32>} : memref<1x256x256xf32, #tpu.memory_space<vmem>>, vector<1x256x256xf32>,
    return
  }
  func.func @transform_0(%arg0: i32, %arg1: i32, %arg2: i32) -> (i32, i32, i32) {
    %c0_i32 = arith.constant 0 : i32
    %c0_i32_0 = arith.constant 0 : i32
    return %arg0, %c0_i32, %arg2 : i32, i32, i32
  }
  func.func @transform_1(%arg0: i32, %arg1: i32, %arg2: i32) -> (i32, i32, i32) {
    %c0_i32 = arith.constant 0 : i32
    %c0_i32_0 = arith.constant 0 : i32
    return %arg0, %c0_i32, %arg1 : i32, i32, i32
  }
  func.func @transform_2(%arg0: i32, %arg1: i32, %arg2: i32) -> (i32, i32, i32) {
    %c0_i32 = arith.constant 0 : i32
    return %arg0, %arg2, %arg1 : i32, i32, i32
  }
}

</mosaic_0001>

<bundles_post_ra>
// kernel: nlm_wo_soft.1
= control target key start
LH: loop header
LB: loop body
LE: loop exit
PB: predicated region body
PF: predicated region fallthrough
CT: control target
= control target key end

     0   :  { %7 = vsyncpa [#allocation3], 0  ;;  %s1285_s0 = inlined_call_operand.vmem [shape: f32[2,8,256], index: 0, kind: input, shape index: {}]   ;;  %s1286_s1 = inlined_call_operand.vmem [shape: f32[2,8,256], index: 1, kind: input, shape index: {}]   ;;  %s1287_s2 = inlined_call_operand.hbm [shape: f32[2,256,256], index: 2, kind: output, shape index: {}]  }
   0x1   :  { %9 = vsyncpa [#allocation3 + $0x1], 0  ;;  %s1033_s9 = smov 0   ;;  %s1035_s10 = smov 0  }
   0x2   :  { %s1037_s11 = smov 0   ;;  %s1039_s12 = smov 0  }
   0x3   :  { %s1041_s13 = smov 0   ;;  %s1043_s14 = smov 0  }
   0x4 LB: > { %s826_s15 = sadd.s32 4294967295, %s1012_s14   ;;  %s827_s16 = sadd.s32 4294967294, %s1012_s14   ;;  %s1012_s14 = sphi %s1043_s14, %s15_s14   ;;  %s1008_s13 = sphi %s1041_s13, %s1294_s13   ;;  %s1004_s12 = sphi %s1039_s12, %s1293_s12   ;;  %s1000_s11 = sphi %s1037_s11, %s1292_s11   ;;  %s996_s10 = sphi %s1035_s10, %s1291_s10   ;;  %s992_s9 = sphi %s1033_s9, %s1290_s9  }
   0x5   : > { %s34_s17 = sadd.s32 1, %s1008_s13  ;;  %s101_s18 = sadd.s32 1, %s1000_s11 }
   0x6   : > { %p36_p0 = scmp.ge.s32.totalorder %s34_s17, 2  ;;  %p111_p1 = scmp.ne.s32.totalorder %s1000_s11, %s996_s10 }
   0x7   : > { %p112_p2 = scmp.eq.s32.totalorder %s826_s15, 1  ;;  %p117_p3 = scmp.ne.s32.totalorder %s996_s10, %s992_s9 }
   0x8   : > { %s1296_s17 = smov (%p36_p0, %s34_s17), 0  ;;  %p118_p5 = scmp.eq.s32.totalorder %s827_s16, 1 }
   0x9   : > { %p1073_p4 = por %p112_p2, %p111_p1  ;;  %s94_s20 = ssub.s32 %s1008_s13, %s1296_s17 }
   0xa   : > { %p830_p6 = scmp.ge.s32.totalorder %s1012_s14, 1  ;;  %p99_p7 = scmp.eq.s32.totalorder %s94_s20, 0 }
   0xb   : > { %p1080_p8 = por %p118_p5, %p117_p3  ;;  %p162_p9 = scmp.lt.s32.totalorder %s1012_s14, 3 }
   0xc   : > { %s1086_s22 = scalar_select %p99_p7, %s1000_s11, %s101_s18  }
   0xd   : > { %p163_p10 = pnand %p830_p6, %p162_p9 }
   0xe   : > { %p198_p11 = scmp.lt.s32.totalorder (!%p163_p10), %s1004_s12, 1  ;;  %s194_s3 = sand.u32 (!%p163_p10), 1, %s996_s10  }
   0xf   : > { %166 = sbr.rel (%p163_p10) target bundleno = 483 (0x1e3), region = 28  ;;  %s831_s4 = sshll.u32 (!%p163_p10), %s194_s3, 9 }
  0x10   : > { %s1163_s5 = scalar_lea.vmem (!%p163_p10), [#allocation2], %s831_s4  ;;  %s875_s6 = sshll.u32 (!%p163_p10), %s1004_s12, 13 }
  0x11   : > { %s724_s7 = sshll.u32 (!%p163_p10), %s1163_s5, 4  ;;  %s1232_s16 = scalar_lea.hbm (!%p163_p10), %s1287_s2, %s875_s6  ;;  %s1234_s7 = int_to_ptr.vmem [resolvable:$true] %s724_s7 }
  0x12   : > { %s1240_s18 = scalar_lea.sflag (!%p163_p10), [#allocation3], %s194_s3  ;;  %s1015_s20 = smov (!%p163_p10), [#allocation2]  }
  0x14   : > { %v1014_v0 = vmov 0.0   ;;  %s199_s23 = scalar_select %p198_p11, %s1004_s12, 1  ;;  %vm287_vm0 = vcmask 64512  }
  0x15   : > { %448 = vmatprep.mubr.f32.mxu0 %v1014_v0  ;;  %544 = vmatprep.mubr.f32.mxu1 %v1014_v0  ;;  %s936_s12 = scalar_lea.vmem %s1234_s7, 8192 }
  0x16   : > { %s873_s24 = sshll.u32 %s199_s23, 4  ;;  %p937_p12 = scmp.ne.s32.totalorder %s1234_s7, %s936_s12 }
  0x17   : > { %s205_s27 = scalar_lea.vmem %s1285_s0, %s873_s24  ;;  %s215_s30 = scalar_lea.vmem %s1286_s1, %s873_s24 }
  0x18   : > { %v219_v1 = vld [vmem:[%s205_s27] sm:$0xff]  ;;  %v222_v2 = vld [vmem:[%s215_s30 + $0x8] sm:$0xff]  ;;  %p938_p13 = pnand %p937_p12, %p1073_p4  ;;  %s940_s23 = sshll.u32 %s1015_s20, 4  ;;  %s941_s23 = int_to_ptr.vmem [resolvable:$false] %s940_s23 }
  0x19   : > { %223 = vxpose.xlu0.b32.start.end [1/1] (short) %v219_v1, 128  ;;  %414 = vmatprep.subr.mxu0 %v222_v2  ;;  %v221_v3 = vld [vmem:[%s215_s30] sm:$0xff]  ;;  %v220_v4 = vld [vmem:[%s205_s27 + $0x8] sm:$0xff]  ;;  %s942_s24 = scalar_lea.vmem %s941_s23, 16384  ;;  %p943_p1 = scmp.lt.s32.totalorder %s1234_s7, %s941_s23 }
  0x1a   : > { %415 = vmatpush1.msra.mxu0 %v221_v3  ;;  %876 = vmatprep.subr.mxu1 %v222_v2  ;;  %p939_p0 = pneg %p938_p13  ;;  %p944_p2 = scmp.lt.s32.totalorder %s942_s24, %s936_s12 }
  0x1b   : > { %877 = vmatpush1.msra.mxu1 %v221_v3 }
  0x1c   : > { %p945_p3 = por %p944_p2, %p943_p1 }
  0x1e   : > { %p946_p5 = pnand %p945_p3, %p939_p0 }
  0x56   : > { %255 = vxpose.xlu0.b32.start.end [1/1] (short) %v220_v4, 128 }
  0x95   : > { %v239_v5 = vpop.trf.xlu0 }
  0x96   : > { %836 = vmatmul.mubr.msk.f32.vlgmr.msra.gmra.mxu0 %vm287_vm0, %v239_v5 }
  0x97   : > { %454 = vmatprep.mubr.f32.mxu0 %v1014_v0 }
  0x99   : > { %v240_v6 = vpop.trf.xlu0 }
  0x9a   : > { %837 = vmatmul.mubr.msk.f32.gmra.mxu0 %vm287_vm0, %v240_v6 }
  0x9b   : > { %460 = vmatprep.mubr.f32.mxu0 %v1014_v0 }
  0x9d   : > { %v241_v7 = vpop.trf.xlu0 }
  0x9e   : > { %838 = vmatmul.mubr.msk.f32.gmra.mxu0 %vm287_vm0, %v241_v7 }
  0x9f   : > { %466 = vmatprep.mubr.f32.mxu0 %v1014_v0 }
  0xa1   : > { %v242_v8 = vpop.trf.xlu0 }
  0xa2   : > { %839 = vmatmul.mubr.msk.f32.gmra.mxu0 %vm287_vm0, %v242_v8 }
  0xa3   : > { %472 = vmatprep.mubr.f32.mxu0 %v1014_v0 }
  0xa5   : > { %v243_v9 = vpop.trf.xlu0 }
  0xa6   : > { %840 = vmatmul.mubr.msk.f32.gmra.mxu0 %vm287_vm0, %v243_v9 }
  0xa7   : > { %478 = vmatprep.mubr.f32.mxu0 %v1014_v0 }
  0xa9   : > { %v244_v10 = vpop.trf.xlu0 }
  0xaa   : > { %841 = vmatmul.mubr.msk.f32.gmra.mxu0 %vm287_vm0, %v244_v10 }
  0xab   : > { %484 = vmatprep.mubr.f32.mxu0 %v1014_v0 }
  0xad   : > { %v245_v11 = vpop.trf.xlu0 }
  0xae   : > { %842 = vmatmul.mubr.msk.f32.gmra.mxu0 %vm287_vm0, %v245_v11 }
  0xaf   : > { %490 = vmatprep.mubr.f32.mxu0 %v1014_v0 }
  0xb1   : > { %v246_v12 = vpop.trf.xlu0 }
  0xb2   : > { %843 = vmatmul.mubr.msk.f32.gmra.mxu0 %vm287_vm0, %v246_v12 }
  0xb3   : > { %496 = vmatprep.mubr.f32.mxu0 %v1014_v0 }
  0xb5   : > { %v247_v13 = vpop.trf.xlu0 }
  0xb6   : > { %844 = vmatmul.mubr.msk.f32.gmra.mxu0 %vm287_vm0, %v247_v13 }
  0xb7   : > { %502 = vmatprep.mubr.f32.mxu0 %v1014_v0 }
  0xb9   : > { %v248_v14 = vpop.trf.xlu0 }
  0xba   : > { %845 = vmatmul.mubr.msk.f32.gmra.mxu0 %vm287_vm0, %v248_v14 }
  0xbb   : > { %508 = vmatprep.mubr.f32.mxu0 %v1014_v0 }
  0xbd   : > { %v249_v15 = vpop.trf.xlu0 }
  0xbe   : > { %846 = vmatmul.mubr.msk.f32.gmra.mxu0 %vm287_vm0, %v249_v15 }
  0xbf   : > { %514 = vmatprep.mubr.f32.mxu0 %v1014_v0 }
  0xc1   : > { %v250_v16 = vpop.trf.xlu0 }
  0xc2   : > { %847 = vmatmul.mubr.msk.f32.gmra.mxu0 %vm287_vm0, %v250_v16 }
  0xc3   : > { %520 = vmatprep.mubr.f32.mxu0 %v1014_v0 }
  0xc5   : > { %v251_v17 = vpop.trf.xlu0 }
  0xc6   : > { %848 = vmatmul.mubr.msk.f32.gmra.mxu0 %vm287_vm0, %v251_v17 }
  0xc7   : > { %526 = vmatprep.mubr.f32.mxu0 %v1014_v0 }
  0xc9   : > { %v252_v18 = vpop.trf.xlu0 }
  0xca   : > { %849 = vmatmul.mubr.msk.f32.gmra.mxu0 %vm287_vm0, %v252_v18 }
  0xcb   : > { %532 = vmatprep.mubr.f32.mxu0 %v1014_v0 }
  0xcd   : > { %v253_v19 = vpop.trf.xlu0 }
  0xce   : > { %850 = vmatmul.mubr.msk.f32.gmra.mxu0 %vm287_vm0, %v253_v19 }
  0xcf   : > { %538 = vmatprep.mubr.f32.mxu0 %v1014_v0 }
  0xd1   : > { %v254_v20 = vpop.trf.xlu0 }
  0xd2   : > { %851 = vmatmul.mubr.msk.f32.gmra.mxu0 %vm287_vm0, %v254_v20 }
  0xd5   : > { %v271_v21 = vpop.trf.xlu0 }
  0xd6   : > { %852 = vmatmul.mubr.msk.f32.vlgmr.msra.gmra.mxu1 %vm287_vm0, %v271_v21 }
  0xd7   : > { %550 = vmatprep.mubr.f32.mxu1 %v1014_v0 }
  0xd9   : > { %v272_v22 = vpop.trf.xlu0 }
  0xda   : > { %853 = vmatmul.mubr.msk.f32.gmra.mxu1 %vm287_vm0, %v272_v22 }
  0xdb   : > { %556 = vmatprep.mubr.f32.mxu1 %v1014_v0 }
  0xdd   : > { %v273_v23 = vpop.trf.xlu0 }
  0xde   : > { %854 = vmatmul.mubr.msk.f32.gmra.mxu1 %vm287_vm0, %v273_v23 }
  0xdf   : > { %562 = vmatprep.mubr.f32.mxu1 %v1014_v0 }
  0xe1   : > { %v274_v24 = vpop.trf.xlu0 }
  0xe2   : > { %855 = vmatmul.mubr.msk.f32.gmra.mxu1 %vm287_vm0, %v274_v24 }
  0xe3   : > { %568 = vmatprep.mubr.f32.mxu1 %v1014_v0 }
  0xe5   : > { %v275_v25 = vpop.trf.xlu0 }
  0xe6   : > { %856 = vmatmul.mubr.msk.f32.gmra.mxu1 %vm287_vm0, %v275_v25 }
  0xe7   : > { %574 = vmatprep.mubr.f32.mxu1 %v1014_v0 }
  0xe9   : > { %v276_v26 = vpop.trf.xlu0 }
  0xea   : > { %857 = vmatmul.mubr.msk.f32.gmra.mxu1 %vm287_vm0, %v276_v26 }
  0xeb   : > { %580 = vmatprep.mubr.f32.mxu1 %v1014_v0 }
  0xed   : > { %v277_v27 = vpop.trf.xlu0 }
  0xee   : > { %858 = vmatmul.mubr.msk.f32.gmra.mxu1 %vm287_vm0, %v277_v27 }
  0xef   : > { %586 = vmatprep.mubr.f32.mxu1 %v1014_v0 }
  0xf1   : > { %v278_v28 = vpop.trf.xlu0 }
  0xf2   : > { %859 = vmatmul.mubr.msk.f32.gmra.mxu1 %vm287_vm0, %v278_v28 }
  0xf3   : > { %592 = vmatprep.mubr.f32.mxu1 %v1014_v0 }
  0xf5   : > { %v279_v29 = vpop.trf.xlu0 }
  0xf6   : > { %860 = vmatmul.mubr.msk.f32.gmra.mxu1 %vm287_vm0, %v279_v29 }
  0xf7   : > { %598 = vmatprep.mubr.f32.mxu1 %v1014_v0 }
  0xf9   : > { %v280_v30 = vpop.trf.xlu0 }
  0xfa   : > { %861 = vmatmul.mubr.msk.f32.gmra.mxu1 %vm287_vm0, %v280_v30 }
  0xfb   : > { %604 = vmatprep.mubr.f32.mxu1 %v1014_v0 }
  0xfd   : > { %v281_v31 = vpop.trf.xlu0 }
  0xfe   : > { %862 = vmatmul.mubr.msk.f32.gmra.mxu1 %vm287_vm0, %v281_v31 }
  0xff   : > { %610 = vmatprep.mubr.f32.mxu1 %v1014_v0 }
 0x101   : > { %v282_v32 = vpop.trf.xlu0 }
 0x102   : > { %863 = vmatmul.mubr.msk.f32.gmra.mxu1 %vm287_vm0, %v282_v32 }
 0x103   : > { %616 = vmatprep.mubr.f32.mxu1 %v1014_v0 }
 0x105   : > { %v283_v33 = vpop.trf.xlu0 }
 0x106   : > { %864 = vmatmul.mubr.msk.f32.gmra.mxu1 %vm287_vm0, %v283_v33 }
 0x107   : > { %622 = vmatprep.mubr.f32.mxu1 %v1014_v0 }
 0x109   : > { %v284_v34 = vpop.trf.xlu0 }
 0x10a   : > { %865 = vmatmul.mubr.msk.f32.gmra.mxu1 %vm287_vm0, %v284_v34 }
 0x10b   : > { %628 = vmatprep.mubr.f32.mxu1 %v1014_v0 }
 0x10d   : > { %v285_v35 = vpop.trf.xlu0 }
 0x10e   : > { %866 = vmatmul.mubr.msk.f32.gmra.mxu1 %vm287_vm0, %v285_v35 }
 0x10f   : > { %634 = vmatprep.mubr.f32.mxu1 %v1014_v0 }
 0x111   : > { %v286_v36 = vpop.trf.xlu0 }
 0x112   : > { %867 = vmatmul.mubr.msk.f32.gmra.mxu1 %vm287_vm0, %v286_v36 }
 0x156   : > { %v450_v37 = vpop.f32.mrf.mxu0 }
 0x157   : > { %641 = vst [vmem:[%s1163_s5] sm:$0xff] %v450_v37 }
 0x158   : > { %v452_v38 = vpop.f32.mrf.mxu0 }
 0x159   : > { %642 = vst [vmem:[%s1163_s5 + $0x8] sm:$0xff] %v452_v38 }
 0x15a   : > { %v456_v39 = vpop.f32.mrf.mxu0 }
 0x15b   : > { %643 = vst [vmem:[%s1163_s5 + $0x10] sm:$0xff] %v456_v39 }
 0x15c   : > { %v458_v40 = vpop.f32.mrf.mxu0 }
 0x15d   : > { %644 = vst [vmem:[%s1163_s5 + $0x18] sm:$0xff] %v458_v40 }
 0x15e   : > { %v462_v41 = vpop.f32.mrf.mxu0 }
 0x15f   : > { %645 = vst [vmem:[%s1163_s5 + $0x20] sm:$0xff] %v462_v41 }
 0x160   : > { %v464_v42 = vpop.f32.mrf.mxu0 }
 0x161   : > { %646 = vst [vmem:[%s1163_s5 + $0x28] sm:$0xff] %v464_v42 }
 0x162   : > { %v468_v43 = vpop.f32.mrf.mxu0 }
 0x163   : > { %647 = vst [vmem:[%s1163_s5 + $0x30] sm:$0xff] %v468_v43 }
 0x164   : > { %v470_v44 = vpop.f32.mrf.mxu0 }
 0x165   : > { %648 = vst [vmem:[%s1163_s5 + $0x38] sm:$0xff] %v470_v44 }
 0x166   : > { %v474_v45 = vpop.f32.mrf.mxu0 }
 0x167   : > { %649 = vst [vmem:[%s1163_s5 + $0x40] sm:$0xff] %v474_v45 }
 0x168   : > { %v476_v46 = vpop.f32.mrf.mxu0 }
 0x169   : > { %650 = vst [vmem:[%s1163_s5 + $0x48] sm:$0xff] %v476_v46 }
 0x16a   : > { %v480_v47 = vpop.f32.mrf.mxu0 }
 0x16b   : > { %651 = vst [vmem:[%s1163_s5 + $0x50] sm:$0xff] %v480_v47 }
 0x16c   : > { %v482_v48 = vpop.f32.mrf.mxu0 }
 0x16d   : > { %652 = vst [vmem:[%s1163_s5 + $0x58] sm:$0xff] %v482_v48 }
 0x16e   : > { %v486_v49 = vpop.f32.mrf.mxu0 }
 0x16f   : > { %653 = vst [vmem:[%s1163_s5 + $0x60] sm:$0xff] %v486_v49 }
 0x170   : > { %v488_v50 = vpop.f32.mrf.mxu0 }
 0x171   : > { %654 = vst [vmem:[%s1163_s5 + $0x68] sm:$0xff] %v488_v50 }
 0x172   : > { %v492_v51 = vpop.f32.mrf.mxu0 }
 0x173   : > { %655 = vst [vmem:[%s1163_s5 + $0x70] sm:$0xff] %v492_v51 }
 0x174   : > { %v494_v52 = vpop.f32.mrf.mxu0 }
 0x175   : > { %656 = vst [vmem:[%s1163_s5 + $0x78] sm:$0xff] %v494_v52 }
 0x176   : > { %v498_v53 = vpop.f32.mrf.mxu0 }
 0x177   : > { %657 = vst [vmem:[%s1163_s5 + $0x80] sm:$0xff] %v498_v53 }
 0x178   : > { %v500_v54 = vpop.f32.mrf.mxu0 }
 0x179   : > { %658 = vst [vmem:[%s1163_s5 + $0x88] sm:$0xff] %v500_v54 }
 0x17a   : > { %v504_v55 = vpop.f32.mrf.mxu0 }
 0x17b   : > { %659 = vst [vmem:[%s1163_s5 + $0x90] sm:$0xff] %v504_v55 }
 0x17c   : > { %v506_v56 = vpop.f32.mrf.mxu0 }
 0x17d   : > { %660 = vst [vmem:[%s1163_s5 + $0x98] sm:$0xff] %v506_v56 }
 0x17e   : > { %v510_v57 = vpop.f32.mrf.mxu0 }
 0x17f   : > { %661 = vst [vmem:[%s1163_s5 + $0xa0] sm:$0xff] %v510_v57 }
 0x180   : > { %v512_v58 = vpop.f32.mrf.mxu0 }
 0x181   : > { %662 = vst [vmem:[%s1163_s5 + $0xa8] sm:$0xff] %v512_v58 }
 0x182   : > { %v516_v59 = vpop.f32.mrf.mxu0 }
 0x183   : > { %663 = vst [vmem:[%s1163_s5 + $0xb0] sm:$0xff] %v516_v59 }
 0x184   : > { %v518_v60 = vpop.f32.mrf.mxu0 }
 0x185   : > { %664 = vst [vmem:[%s1163_s5 + $0xb8] sm:$0xff] %v518_v60 }
 0x186   : > { %v522_v61 = vpop.f32.mrf.mxu0 }
 0x187   : > { %665 = vst [vmem:[%s1163_s5 + $0xc0] sm:$0xff] %v522_v61 }
 0x188   : > { %v524_v62 = vpop.f32.mrf.mxu0 }
 0x189   : > { %666 = vst [vmem:[%s1163_s5 + $0xc8] sm:$0xff] %v524_v62 }
 0x18a   : > { %v528_v63 = vpop.f32.mrf.mxu0 }
 0x18b   : > { %667 = vst [vmem:[%s1163_s5 + $0xd0] sm:$0xff] %v528_v63 }
 0x18c   : > { %v530_v0 = vpop.f32.mrf.mxu0 }
 0x18d   : > { %668 = vst [vmem:[%s1163_s5 + $0xd8] sm:$0xff] %v530_v0 }
 0x18e   : > { %v534_v1 = vpop.f32.mrf.mxu0 }
 0x18f   : > { %669 = vst [vmem:[%s1163_s5 + $0xe0] sm:$0xff] %v534_v1 }
 0x190   : > { %v536_v2 = vpop.f32.mrf.mxu0 }
 0x191   : > { %670 = vst [vmem:[%s1163_s5 + $0xe8] sm:$0xff] %v536_v2 }
 0x192   : > { %v540_v3 = vpop.f32.mrf.mxu0 }
 0x193   : > { %671 = vst [vmem:[%s1163_s5 + $0xf0] sm:$0xff] %v540_v3 }
 0x194   : > { %v542_v4 = vpop.f32.mrf.mxu0 }
 0x195   : > { %672 = vst [vmem:[%s1163_s5 + $0xf8] sm:$0xff] %v542_v4 }
 0x196   : > { %v546_v5 = vpop.f32.mrf.mxu1 }
 0x197   : > { %673 = vst [vmem:[%s1163_s5 + $0x100] sm:$0xff] %v546_v5 }
 0x198   : > { %v548_v6 = vpop.f32.mrf.mxu1 }
 0x199   : > { %674 = vst [vmem:[%s1163_s5 + $0x108] sm:$0xff] %v548_v6 }
 0x19a   : > { %v552_v7 = vpop.f32.mrf.mxu1 }
 0x19b   : > { %675 = vst [vmem:[%s1163_s5 + $0x110] sm:$0xff] %v552_v7 }
 0x19c   : > { %v554_v8 = vpop.f32.mrf.mxu1 }
 0x19d   : > { %676 = vst [vmem:[%s1163_s5 + $0x118] sm:$0xff] %v554_v8 }
 0x19e   : > { %v558_v9 = vpop.f32.mrf.mxu1 }
 0x19f   : > { %677 = vst [vmem:[%s1163_s5 + $0x120] sm:$0xff] %v558_v9 }
 0x1a0   : > { %v560_v10 = vpop.f32.mrf.mxu1 }
 0x1a1   : > { %678 = vst [vmem:[%s1163_s5 + $0x128] sm:$0xff] %v560_v10 }
 0x1a2   : > { %v564_v11 = vpop.f32.mrf.mxu1 }
 0x1a3   : > { %679 = vst [vmem:[%s1163_s5 + $0x130] sm:$0xff] %v564_v11 }
 0x1a4   : > { %v566_v12 = vpop.f32.mrf.mxu1 }
 0x1a5   : > { %680 = vst [vmem:[%s1163_s5 + $0x138] sm:$0xff] %v566_v12 }
 0x1a6   : > { %v570_v13 = vpop.f32.mrf.mxu1 }
 0x1a7   : > { %681 = vst [vmem:[%s1163_s5 + $0x140] sm:$0xff] %v570_v13 }
 0x1a8   : > { %v572_v14 = vpop.f32.mrf.mxu1 }
 0x1a9   : > { %682 = vst [vmem:[%s1163_s5 + $0x148] sm:$0xff] %v572_v14 }
 0x1aa   : > { %v576_v15 = vpop.f32.mrf.mxu1 }
 0x1ab   : > { %683 = vst [vmem:[%s1163_s5 + $0x150] sm:$0xff] %v576_v15 }
 0x1ac   : > { %v578_v16 = vpop.f32.mrf.mxu1 }
 0x1ad   : > { %684 = vst [vmem:[%s1163_s5 + $0x158] sm:$0xff] %v578_v16 }
 0x1ae   : > { %v582_v17 = vpop.f32.mrf.mxu1 }
 0x1af   : > { %685 = vst [vmem:[%s1163_s5 + $0x160] sm:$0xff] %v582_v17 }
 0x1b0   : > { %v584_v18 = vpop.f32.mrf.mxu1 }
 0x1b1   : > { %686 = vst [vmem:[%s1163_s5 + $0x168] sm:$0xff] %v584_v18 }
 0x1b2   : > { %v588_v19 = vpop.f32.mrf.mxu1 }
 0x1b3   : > { %687 = vst [vmem:[%s1163_s5 + $0x170] sm:$0xff] %v588_v19 }
 0x1b4   : > { %v590_v20 = vpop.f32.mrf.mxu1 }
 0x1b5   : > { %688 = vst [vmem:[%s1163_s5 + $0x178] sm:$0xff] %v590_v20 }
 0x1b6   : > { %v594_v21 = vpop.f32.mrf.mxu1 }
 0x1b7   : > { %689 = vst [vmem:[%s1163_s5 + $0x180] sm:$0xff] %v594_v21 }
 0x1b8   : > { %v596_v22 = vpop.f32.mrf.mxu1 }
 0x1b9   : > { %690 = vst [vmem:[%s1163_s5 + $0x188] sm:$0xff] %v596_v22 }
 0x1ba   : > { %v600_v23 = vpop.f32.mrf.mxu1 }
 0x1bb   : > { %691 = vst [vmem:[%s1163_s5 + $0x190] sm:$0xff] %v600_v23 }
 0x1bc   : > { %v602_v24 = vpop.f32.mrf.mxu1 }
 0x1bd   : > { %692 = vst [vmem:[%s1163_s5 + $0x198] sm:$0xff] %v602_v24 }
 0x1be   : > { %v606_v25 = vpop.f32.mrf.mxu1 }
 0x1bf   : > { %693 = vst [vmem:[%s1163_s5 + $0x1a0] sm:$0xff] %v606_v25 }
 0x1c0   : > { %v608_v26 = vpop.f32.mrf.mxu1 }
 0x1c1   : > { %694 = vst [vmem:[%s1163_s5 + $0x1a8] sm:$0xff] %v608_v26 }
 0x1c2   : > { %v612_v27 = vpop.f32.mrf.mxu1 }
 0x1c3   : > { %695 = vst [vmem:[%s1163_s5 + $0x1b0] sm:$0xff] %v612_v27 }
 0x1c4   : > { %v614_v28 = vpop.f32.mrf.mxu1 }
 0x1c5   : > { %696 = vst [vmem:[%s1163_s5 + $0x1b8] sm:$0xff] %v614_v28 }
 0x1c6   : > { %v618_v29 = vpop.f32.mrf.mxu1 }
 0x1c7   : > { %697 = vst [vmem:[%s1163_s5 + $0x1c0] sm:$0xff] %v618_v29 }
 0x1c8   : > { %v620_v30 = vpop.f32.mrf.mxu1 }
 0x1c9   : > { %698 = vst [vmem:[%s1163_s5 + $0x1c8] sm:$0xff] %v620_v30 }
 0x1ca   : > { %v624_v31 = vpop.f32.mrf.mxu1 }
 0x1cb   : > { %699 = vst [vmem:[%s1163_s5 + $0x1d0] sm:$0xff] %v624_v31 }
 0x1cc   : > { %v626_v32 = vpop.f32.mrf.mxu1 }
 0x1cd   : > { %700 = vst [vmem:[%s1163_s5 + $0x1d8] sm:$0xff] %v626_v32 }
 0x1ce   : > { %v630_v33 = vpop.f32.mrf.mxu1 }
 0x1cf   : > { %701 = vst [vmem:[%s1163_s5 + $0x1e0] sm:$0xff] %v630_v33 }
 0x1d0   : > { %v632_v34 = vpop.f32.mrf.mxu1 }
 0x1d1   : > { %702 = vst [vmem:[%s1163_s5 + $0x1e8] sm:$0xff] %v632_v34 }
 0x1d2   : > { %v636_v35 = vpop.f32.mrf.mxu1 }
 0x1d3   : > { %703 = vst [vmem:[%s1163_s5 + $0x1f0] sm:$0xff] %v636_v35 }
 0x1d4   : > { %v638_v36 = vpop.f32.mrf.mxu1 }
 0x1d5   : > { %704 = vst [vmem:[%s1163_s5 + $0x1f8] sm:$0xff] %v638_v36 }
 0x1d6   : > { %949 = shalt.err (!%p946_p5)
}
 0x1d7   : > { %s950_s25 = scalar_lea.hbm %s1232_s16, 8192  ;;  %s954_s28 = scalar_lea.hbm %s1287_s2, 16384 }
 0x1d8   : > { %p951_p6 = scmp.ne.s32.totalorder %s1232_s16, %s950_s25  ;;  %p955_p10 = scmp.lt.s32.totalorder %s1232_s16, %s1287_s2 }
 0x1d9   : > { %p956_p11 = scmp.lt.s32.totalorder %s954_s28, %s950_s25 }
 0x1da   : > { %p952_p7 = pnand %p951_p6, %p1073_p4 }
 0x1db   : > { %p957_p12 = por %p956_p11, %p955_p10 }
 0x1dc   : > { %p953_p9 = pneg %p952_p7 }
 0x1de   : > { %p958_p13 = pnand %p957_p12, %p953_p9 }
 0x1e0   : > { %961 = shalt.err (!%p958_p13)
}
 0x1e1   : > { %s1016_s3 = smov 256   ;;  %s1017_s4 = smov 16  }
 0x1e2   : > { %878 = dma.vmem_to_hbm [thread:$0]  (%p1073_p4), %s1234_s7, 8192, %s1232_s16, %s1240_s18, %s1016_s3, %s1016_s3, %s1017_s4  }
 0x1e3 PF: > { %p884_p0 = scmp.ge.s32.totalorder %s1012_s14, 2  ;;  %s739_s5 = sand.u32 1, %s992_s9  }
 0x1e4   : > { %s740_s6 = scalar_lea.sflag [#allocation3], %s739_s5 }
 0x1e5   : > { %p881_p1 = pnand %p884_p0, %p1080_p8 }
 0x1e7   : > { %p882_p2 = pneg %p881_p1 }
 0x1e9   : > { %987 = dma.done.wait (%p882_p2), %s740_s6, 8192  }
 0x1ea   : > { %989 = vsyncadd (%p882_p2), %s740_s6, 4294959104  ;;  %s15_s14 = sadd.s32 1, %s1012_s14   ;;  %s1290_s9 = smov %s996_s10 }
 0x1eb   : > { %p12_p3 = scmp.ge.s32.totalorder %s15_s14, 4   ;;  %s1291_s10 = smov %s1000_s11 }
 0x1ec   : > { %s1292_s11 = smov %s1086_s22  ;;  %s1293_s12 = smov %s1008_s13 }
 0x1ed   : > { %s1294_s13 = smov %s1296_s17  ;;  %14 = sbr.rel (!%p12_p3) target bundleno = 4 (0x4), region = 66 }
 0x1f2   :  { %745 = vsyncpa [#allocation3], 1 }
 0x1f3   :  { %747 = vsyncpa [#allocation3 + $0x1], 1 }

</bundles_post_ra>
